<compile_context>
chip_gen: v6e
topology: v6e:2x2x1
jax: 0.10.0
libtpu: 0.0.40
codegen_flags: <defaults>
</compile_context>

<pallas_src>
import functools
import math

import jax
import jax.numpy as jnp
from jax.experimental import pallas as pl
from jax.experimental.pallas import tpu as pltpu

# ---------------- config (small synthetic BERT) ----------------
VOCAB = 100
MAX_POS = 16
HIDDEN = 32
N_HEADS = 2
HEAD_DIM = HIDDEN // N_HEADS
INTERMEDIATE = 64
N_LAYERS = 2
NUM_CLASS = 3
LANE = 128                 # every matmul N dim is zero-padded to one full lane group
CLS_PAD = LANE             # lane-dense classifier output; sliced to NUM_CLASS in JAX
DROPOUT_P = 0.3
LN_EPS = 1e-12

# ---- packed per-layer weight slab rows (bf16, all N padded to 128 lanes) ----
W_QKV_OFF = 0                      # rows  0: 32  [HIDDEN,128]  cols 0:96  = Wq|Wk|Wv
W_O_OFF = HIDDEN                   # rows 32: 64  [HIDDEN,128]  cols 0:32  = attn out proj
W_I_OFF = 2 * HIDDEN               # rows 64: 96  [HIDDEN,128]  cols 0:64  = FFN in
W_O2_OFF = 3 * HIDDEN              # rows 96:224  [128,128]     rows 0:64 / cols 0:32 real
W_ROWS = 3 * HIDDEN + LANE         # 224

# ---- packed per-layer vector slab rows (f32, 128 lanes each) ----
V_BQKV, V_BO, V_G1, V_B1, V_BI, V_BO2, V_G2, V_B2 = range(8)
V_ROWS = 8

# ---- packed head weight slab (bf16, resident) ----
HW_POOL_OFF = 0                    # rows 0:32   pooler weight   (cols 0:32 real)
HW_CLS_OFF = HIDDEN                # rows 32:160 classifier      (rows 0:32, cols 0:NUM_CLASS real)
HW_ROWS = HIDDEN + LANE            # 160

# ---- misc resident slab rows (f32, 128 lanes) ----
M_EG, M_EB, M_PB, M_CB, M_KEEP = 0, 1, 2, 3, 4     # keep-mask rows are 4 : 4+batch


def _layernorm(x, gamma, beta):
    mean = jnp.mean(x, axis=-1, keepdims=True)
    var = jnp.mean(jnp.square(x - mean), axis=-1, keepdims=True)
    return (x - mean) * jax.lax.rsqrt(var + LN_EPS) * gamma + beta


# ---------------- fused encoder + head: one pallas_call, one grid step per layer ----------------
def _bert_kernel(emb_ref, mask_ref, misc_ref, hw_ref, w_ref, v_ref,
                 logits_ref, x_scr, *, batch, seq):
    layer = pl.program_id(0)
    tokens = batch * seq
    misc = misc_ref[...]                                    # [4+B, 128] f32 (resident)

    # Fold the embedding LayerNorm into grid step 0; activation lives in VMEM scratch.
    @pl.when(layer == 0)
    def _():
        x_scr[...] = _layernorm(emb_ref[...],
                                misc[M_EG:M_EG + 1, :HIDDEN],
                                misc[M_EB:M_EB + 1, :HIDDEN])

    x = x_scr[...]                                          # [B*S, HIDDEN] f32
    vec = v_ref[...]                                        # [8, 128] f32 per-layer biases/LN

    # Fused QKV projection: one MXU push, lane-dense (128) padded N.
    qkv = jnp.dot(x.astype(jnp.bfloat16),
                  w_ref[W_QKV_OFF:W_QKV_OFF + HIDDEN, :],
                  preferred_element_type=jnp.float32) + vec[V_BQKV:V_BQKV + 1]
    qkv3 = qkv.reshape(batch, seq, LANE)

    mask = mask_ref[...]                                    # [B, S] additive (0 / -1e9)
    scale = 1.0 / math.sqrt(HEAD_DIM)

    # TODO(synk): a single 4-D batched einsum over (batch, head) would remove the static head
    # unroll, but multi-batch-dim dot_general is not guaranteed to lower in Mosaic; heads are
    # unrolled with 3-D (single-batch) einsums and the output projection is accumulated per
    # head, which removes the old ctx_heads concatenate/relayout.
    attn = vec[V_BO:V_BO + 1]                               # start from the output-proj bias
    for h in range(N_HEADS):
        q = qkv3[:, :, h * HEAD_DIM:(h + 1) * HEAD_DIM]
        k = qkv3[:, :, HIDDEN + h * HEAD_DIM:HIDDEN + (h + 1) * HEAD_DIM]
        v = qkv3[:, :, 2 * HIDDEN + h * HEAD_DIM:2 * HIDDEN + (h + 1) * HEAD_DIM]
        s = jnp.einsum("bqd,bkd->bqk", q.astype(jnp.bfloat16), k.astype(jnp.bfloat16),
                       preferred_element_type=jnp.float32)
        s = s * scale + mask[:, None, :]                    # broadcast additive mask in-kernel
        s = s - jnp.max(s, axis=-1, keepdims=True)
        p = jnp.exp(s)
        p = p * pl.reciprocal(jnp.sum(p, axis=-1, keepdims=True), approx=True)
        ctx = jnp.einsum("bqk,bkd->bqd", p.astype(jnp.bfloat16), v.astype(jnp.bfloat16),
                         preferred_element_type=jnp.float32).reshape(tokens, HEAD_DIM)
        attn = attn + jnp.dot(
            ctx.astype(jnp.bfloat16),
            w_ref[W_O_OFF + h * HEAD_DIM:W_O_OFF + (h + 1) * HEAD_DIM, :],
            preferred_element_type=jnp.float32)

    x1 = _layernorm(attn[:, :HIDDEN] + x,
                    vec[V_G1:V_G1 + 1, :HIDDEN], vec[V_B1:V_B1 + 1, :HIDDEN])

    # TODO(synk): HF BERT uses exact erf GELU; tanh approximation kept for guaranteed lowering.
    hmid = jax.nn.gelu(
        jnp.dot(x1.astype(jnp.bfloat16), w_ref[W_I_OFF:W_I_OFF + HIDDEN, :],
                preferred_element_type=jnp.float32) + vec[V_BI:V_BI + 1],
        approximate=True)                                   # cols 64:128 are gelu(0) = 0
    ffn = jnp.dot(hmid.astype(jnp.bfloat16), w_ref[W_O2_OFF:W_O2_OFF + LANE, :],
                  preferred_element_type=jnp.float32) + vec[V_BO2:V_BO2 + 1]
    x_new = _layernorm(ffn[:, :HIDDEN] + x1,
                       vec[V_G2:V_G2 + 1, :HIDDEN], vec[V_B2:V_B2 + 1, :HIDDEN])
    x_scr[...] = x_new                                      # carry to next layer in VMEM

    # Fused head on the last grid step: pooler(tanh) -> dropout -> classifier.
    # TODO(synk): HF BERT also applies dropout inside the encoder (emb / attn probs / hidden);
    # only the module's explicit post-pooler nn.Dropout is implemented.
    @pl.when(layer == N_LAYERS - 1)
    def _():
        cls = x_new.reshape(batch, seq, HIDDEN)[:, 0, :]    # [CLS] token per sequence
        pooled = jnp.tanh(
            jnp.dot(cls.astype(jnp.bfloat16), hw_ref[HW_POOL_OFF:HW_POOL_OFF + HIDDEN, :],
                    preferred_element_type=jnp.float32) + misc[M_PB:M_PB + 1])
        dropped = pooled * misc[M_KEEP:M_KEEP + batch]      # pre-scaled keep mask
        logits_ref[...] = jnp.dot(
            dropped.astype(jnp.bfloat16), hw_ref[HW_CLS_OFF:HW_CLS_OFF + LANE, :],
            preferred_element_type=jnp.float32) + misc[M_CB:M_CB + 1]


def bert_forward_pallas(emb, mask_add, misc, head_w, w_slab, v_slab, batch, seq):
    tokens = batch * seq

    flops_layer = (2 * tokens * HIDDEN * LANE                                   # qkv
                   + N_HEADS * (4 * batch * seq * seq * HEAD_DIM                # scores + pv
                                + 2 * tokens * HEAD_DIM * LANE)                 # out proj
                   + 2 * tokens * HIDDEN * LANE                                 # ffn in
                   + 2 * tokens * LANE * LANE)                                  # ffn out
    flops = N_LAYERS * flops_layer + 2 * batch * HIDDEN * LANE + 2 * batch * LANE * LANE
    transcendentals = N_LAYERS * (batch * N_HEADS * seq * seq + tokens * LANE) + batch * LANE
    bytes_accessed = int(emb.size * 4 + mask_add.size * 4 + misc.size * 4
                         + head_w.size * 2 + w_slab.size * 2 + v_slab.size * 4
                         + batch * CLS_PAD * 4)

    return pl.pallas_call(
        functools.partial(_bert_kernel, batch=batch, seq=seq),
        out_shape=jax.ShapeDtypeStruct((batch, CLS_PAD), jnp.float32),
        grid=(N_LAYERS,),
        in_specs=[
            pl.BlockSpec((tokens, HIDDEN), lambda l: (0, 0)),        # embeddings (pre-LN)
            pl.BlockSpec((batch, seq), lambda l: (0, 0)),            # additive attention mask
            pl.BlockSpec((4 + batch, LANE), lambda l: (0, 0)),       # emb-LN/pooler-b/cls-b/keep
            pl.BlockSpec((HW_ROWS, LANE), lambda l: (0, 0)),         # pooler + classifier slab
            pl.BlockSpec((None, W_ROWS, LANE), lambda l: (l, 0, 0)),  # per-layer weight slab
            pl.BlockSpec((None, V_ROWS, LANE), lambda l: (l, 0, 0)),  # per-layer bias/LN slab
        ],
        out_specs=pl.BlockSpec((batch, CLS_PAD), lambda l: (0, 0)),  # lane-dense logits only
        scratch_shapes=[pltpu.VMEM((tokens, HIDDEN), jnp.float32)],  # layer-carried activation
        compiler_params=pltpu.CompilerParams(dimension_semantics=("arbitrary",)),
        cost_estimate=pl.CostEstimate(flops=flops, transcendentals=transcendentals,
                                      bytes_accessed=bytes_accessed),
    )(emb, mask_add, misc, head_w, w_slab, v_slab)


# ---------------- parameter init (deterministic, synthetic, pre-packed slabs) ----------------
def init_params(key):
    def nrm(k, shape, scale=0.02):
        return scale * jax.random.normal(k, shape, jnp.float32)

    keys = iter(jax.random.split(key, 5 + 4 * N_LAYERS))

    params = {
        "word_emb": nrm(next(keys), (VOCAB, HIDDEN)),
        "pos_emb": nrm(next(keys), (MAX_POS, HIDDEN)),
        "type_emb": nrm(next(keys), (2, HIDDEN)),
    }

    # head weight slab: pooler [32,128] over classifier [128,128], zero-padded, bf16.
    pooler_w = nrm(next(keys), (HIDDEN, HIDDEN))
    cls_w = nrm(next(keys), (HIDDEN, NUM_CLASS))
    hw = jnp.zeros((HW_ROWS, LANE), jnp.float32)
    hw = hw.at[HW_POOL_OFF:HW_POOL_OFF + HIDDEN, :HIDDEN].set(pooler_w)
    hw = hw.at[HW_CLS_OFF:HW_CLS_OFF + HIDDEN, :NUM_CLASS].set(cls_w)
    params["head_w"] = hw.astype(jnp.bfloat16)

    # resident misc slab (emb LN gamma/beta, pooler bias, classifier bias); keep-mask rows are
    # appended per call in the wrapper.
    misc = jnp.zeros((4, LANE), jnp.float32)
    misc = misc.at[M_EG, :HIDDEN].set(1.0)                  # emb LN gamma = 1, rest zero
    params["misc_base"] = misc

    w_layers, v_layers = [], []
    for _ in range(N_LAYERS):
        w = jnp.zeros((W_ROWS, LANE), jnp.float32)
        w = w.at[W_QKV_OFF:W_QKV_OFF + HIDDEN, :3 * HIDDEN].set(
            nrm(next(keys), (HIDDEN, 3 * HIDDEN)))
        w = w.at[W_O_OFF:W_O_OFF + HIDDEN, :HIDDEN].set(nrm(next(keys), (HIDDEN, HIDDEN)))
        w = w.at[W_I_OFF:W_I_OFF + HIDDEN, :INTERMEDIATE].set(
            nrm(next(keys), (HIDDEN, INTERMEDIATE)))
        w = w.at[W_O2_OFF:W_O2_OFF + INTERMEDIATE, :HIDDEN].set(
            nrm(next(keys), (INTERMEDIATE, HIDDEN)))
        w_layers.append(w.astype(jnp.bfloat16))

        v = jnp.zeros((V_ROWS, LANE), jnp.float32)
        v = v.at[V_G1, :HIDDEN].set(1.0)                    # LN gammas = 1
        v = v.at[V_G2, :HIDDEN].set(1.0)                    # biases / LN betas stay zero
        v_layers.append(v)

    params["w_slab"] = jnp.stack(w_layers)                  # [N_LAYERS, 224, 128] bf16
    params["v_slab"] = jnp.stack(v_layers)                  # [N_LAYERS, 8, 128]  f32
    return params


# ---------------- forward pass (embedding gather in JAX, everything else in one kernel) ----------------
def bert_extraction_forward(params, input_ids, attention_mask, dropout_key, train=True):
    batch, seq = input_ids.shape
    emb = (params["word_emb"][input_ids]
           + params["pos_emb"][:seq][None, :, :]
           + params["type_emb"][0][None, None, :])          # token_type_ids == 0
    emb = emb.reshape(batch * seq, HIDDEN).astype(jnp.float32)

    mask_add = (1.0 - attention_mask.astype(jnp.float32)) * -1e9   # [B, S] additive mask

    # Post-pooler nn.Dropout keep-mask (training mode), pre-scaled by 1/(1-p).
    # TODO(synk): on hardware this could move in-kernel via pltpu.prng_seed/prng_random_bits
    # with a scalar SMEM seed; kept in jax.random for portability (interpret/CPU testing).
    if train:
        keep = jax.random.bernoulli(dropout_key, 1.0 - DROPOUT_P, (batch, LANE))
        keep_mask = keep.astype(jnp.float32) * (1.0 / (1.0 - DROPOUT_P))
    else:
        keep_mask = jnp.ones((batch, LANE), jnp.float32)
    misc = jnp.concatenate([params["misc_base"], keep_mask], axis=0)

    logits_pad = bert_forward_pallas(emb, mask_add, misc, params["head_w"],
                                     params["w_slab"], params["v_slab"], batch, seq)
    return logits_pad[:, :NUM_CLASS]                         # lane-dense (128) out, slice in JAX


if __name__ == "__main__":
    root = jax.random.PRNGKey(0)
    k_param, k_ids, k_drop = jax.random.split(root, 3)

    B, S = 2, 8
    params = init_params(k_param)
    input_ids = jax.random.randint(k_ids, (B, S), 0, VOCAB, dtype=jnp.int32)
    attention_mask = jnp.array([[1, 1, 1, 1, 1, 1, 1, 1],
                                [1, 1, 1, 1, 1, 0, 0, 0]], dtype=jnp.int32)

    fwd = jax.jit(functools.partial(bert_extraction_forward, train=True))
    logits = fwd(params, input_ids, attention_mask, k_drop)
    jax.block_until_ready(logits)
    assert logits.shape == (B, NUM_CLASS)
    assert bool(jnp.all(jnp.isfinite(logits)))
    print("KERNEL_OK")
</pallas_src>

<mosaic_0001>
module attributes {stable_mosaic.version = 11 : i64} {
  func.func @_bert_kernel(%arg0: i32, %arg1: memref<16x32xf32, #tpu.memory_space<vmem>>, %arg2: memref<2x8xf32, #tpu.memory_space<vmem>>, %arg3: memref<6x128xf32, #tpu.memory_space<vmem>>, %arg4: memref<160x128xbf16, #tpu.memory_space<vmem>>, %arg5: memref<1x224x128xbf16, #tpu.memory_space<vmem>>, %arg6: memref<1x8x128xf32, #tpu.memory_space<vmem>>, %arg7: memref<2x128xf32, #tpu.memory_space<vmem>>, %arg8: memref<16x32xf32, #tpu.memory_space<vmem>>) attributes {dimension_semantics = [#tpu.dimension_semantics<arbitrary>], iteration_bounds = array<i64: 2>, scalar_prefetch = 0 : i64, scratch_operands = 1 : i64, tpu.core_type = #tpu.core_type<tc>, window_params = [{pipeline_mode = #tpu.pipeline_mode<synchronous>, transform_indices = @transform_0, window_bounds = array<i64: 16, 32>}, {pipeline_mode = #tpu.pipeline_mode<synchronous>, transform_indices = @transform_1, window_bounds = array<i64: 2, 8>}, {pipeline_mode = #tpu.pipeline_mode<synchronous>, transform_indices = @transform_2, window_bounds = array<i64: 6, 128>}, {pipeline_mode = #tpu.pipeline_mode<synchronous>, transform_indices = @transform_3, window_bounds = array<i64: 160, 128>}, {transform_indices = @transform_4, window_bounds = array<i64: 1, 224, 128>}, {transform_indices = @transform_5, window_bounds = array<i64: 1, 8, 128>}, {pipeline_mode = #tpu.pipeline_mode<synchronous>, transform_indices = @transform_6, window_bounds = array<i64: 2, 128>}]} {
    %c0 = arith.constant 0 : index
    %c0_0 = arith.constant 0 : index
    %0 = vector.load %arg3[%c0, %c0_0] : memref<6x128xf32, #tpu.memory_space<vmem>>, vector<6x128xf32>
    %c0_i32 = arith.constant 0 : i32
    %1 = arith.cmpi eq, %arg0, %c0_i32 : i32
    %2 = arith.extui %1 : i1 to i32
    %c0_i32_1 = arith.constant 0 : i32
    %3 = arith.cmpi ne, %2, %c0_i32_1 : i32
    scf.if %3 {
      %c0_51 = arith.constant 0 : index
      %c0_52 = arith.constant 0 : index
      %161 = vector.load %arg1[%c0_51, %c0_52] : memref<16x32xf32, #tpu.memory_space<vmem>>, vector<16x32xf32>
      %162 = vector.extract_strided_slice %0 {offsets = [0, 0], sizes = [1, 32], strides = [1, 1]} : vector<6x128xf32> to vector<1x32xf32>
      %163 = vector.extract_strided_slice %0 {offsets = [1, 0], sizes = [1, 32], strides = [1, 1]} : vector<6x128xf32> to vector<1x32xf32>
      %cst_53 = arith.constant dense<0.000000e+00> : vector<16xf32>
      %164 = vector.multi_reduction <add>, %161, %cst_53 [1] : vector<16x32xf32> to vector<16xf32>
      %165 = vector.shape_cast %164 : vector<16xf32> to vector<16x1xf32>
      %cst_54 = arith.constant 3.200000e+01 : f32
      %166 = vector.broadcast %cst_54 : f32 to vector<16x1xf32>
      %167 = arith.divf %165, %166 : vector<16x1xf32>
      %168 = vector.broadcast %167 : vector<16x1xf32> to vector<16x32xf32>
      %169 = arith.subf %161, %168 : vector<16x32xf32>
      %170 = arith.mulf %169, %169 : vector<16x32xf32>
      %cst_55 = arith.constant dense<0.000000e+00> : vector<16xf32>
      %171 = vector.multi_reduction <add>, %170, %cst_55 [1] : vector<16x32xf32> to vector<16xf32>
      %172 = vector.shape_cast %171 : vector<16xf32> to vector<16x1xf32>
      %cst_56 = arith.constant 3.200000e+01 : f32
      %173 = vector.broadcast %cst_56 : f32 to vector<16x1xf32>
      %174 = arith.divf %172, %173 : vector<16x1xf32>
      %175 = vector.broadcast %167 : vector<16x1xf32> to vector<16x32xf32>
      %176 = arith.subf %161, %175 : vector<16x32xf32>
      %cst_57 = arith.constant 9.99999996E-13 : f32
      %177 = vector.broadcast %cst_57 : f32 to vector<16x1xf32>
      %178 = arith.addf %174, %177 : vector<16x1xf32>
      %179 = math.rsqrt %178 : vector<16x1xf32>
      %180 = vector.broadcast %179 : vector<16x1xf32> to vector<16x32xf32>
      %181 = arith.mulf %176, %180 : vector<16x32xf32>
      %182 = vector.broadcast %162 : vector<1x32xf32> to vector<16x32xf32>
      %183 = arith.mulf %181, %182 : vector<16x32xf32>
      %184 = vector.broadcast %163 : vector<1x32xf32> to vector<16x32xf32>
      %185 = arith.addf %183, %184 : vector<16x32xf32>
      %c0_58 = arith.constant 0 : index
      %c0_59 = arith.constant 0 : index
      %186 = vector.load %arg8[%c0_58, %c0_59] : memref<16x32xf32, #tpu.memory_space<vmem>>, vector<16x32xf32>
      tpu.vector_store %arg8[%c0_58, %c0_59], %185 {strides = array<i32>} : memref<16x32xf32, #tpu.memory_space<vmem>>, vector<16x32xf32>,
    } else {
    }
    %c0_2 = arith.constant 0 : index
    %c0_3 = arith.constant 0 : index
    %4 = vector.load %arg8[%c0_2, %c0_3] : memref<16x32xf32, #tpu.memory_space<vmem>>, vector<16x32xf32>
    %c0_4 = arith.constant 0 : index
    %c0_5 = arith.constant 0 : index
    %c0_6 = arith.constant 0 : index
    %5 = vector.load %arg6[%c0_4, %c0_5, %c0_6] : memref<1x8x128xf32, #tpu.memory_space<vmem>>, vector<1x8x128xf32>
    %6 = vector.shape_cast %5 : vector<1x8x128xf32> to vector<8x128xf32>
    %7 = arith.truncf %4 : vector<16x32xf32> to vector<16x32xbf16>
    %c0_7 = arith.constant 0 : index
    %c0_8 = arith.constant 0 : index
    %c0_9 = arith.constant 0 : index
    %8 = vector.load %arg5[%c0_7, %c0_8, %c0_9] : memref<1x224x128xbf16, #tpu.memory_space<vmem>>, vector<1x32x128xbf16>
    %9 = vector.shape_cast %8 : vector<1x32x128xbf16> to vector<32x128xbf16>
    %cst = arith.constant dense<0.000000e+00> : vector<16x128xf32>
    %10 = tpu.matmul %7, %9, %cst {dimension_numbers = #tpu.dot_dimension_numbers<[1], [0], [0], [1], [0, 0, 1, 1], [], []>} : vector<16x32xbf16>, vector<32x128xbf16>, vector<16x128xf32> -> vector<16x128xf32>
    %11 = vector.extract_strided_slice %6 {offsets = [0, 0], sizes = [1, 128], strides = [1, 1]} : vector<8x128xf32> to vector<1x128xf32>
    %12 = vector.broadcast %11 : vector<1x128xf32> to vector<16x128xf32>
    %13 = arith.addf %10, %12 : vector<16x128xf32>
    %14 = vector.shape_cast %13 : vector<16x128xf32> to vector<2x8x128xf32>
    %c0_10 = arith.constant 0 : index
    %c0_11 = arith.constant 0 : index
    %15 = vector.load %arg2[%c0_10, %c0_11] : memref<2x8xf32, #tpu.memory_space<vmem>>, vector<2x8xf32>
    %16 = vector.extract_strided_slice %6 {offsets = [1, 0], sizes = [1, 128], strides = [1, 1]} : vector<8x128xf32> to vector<1x128xf32>
    %17 = vector.extract_strided_slice %14 {offsets = [0, 0, 0], sizes = [2, 8, 16], strides = [1, 1, 1]} : vector<2x8x128xf32> to vector<2x8x16xf32>
    %18 = vector.extract_strided_slice %14 {offsets = [0, 0, 32], sizes = [2, 8, 16], strides = [1, 1, 1]} : vector<2x8x128xf32> to vector<2x8x16xf32>
    %19 = vector.extract_strided_slice %14 {offsets = [0, 0, 64], sizes = [2, 8, 16], strides = [1, 1, 1]} : vector<2x8x128xf32> to vector<2x8x16xf32>
    %20 = arith.truncf %17 : vector<2x8x16xf32> to vector<2x8x16xbf16>
    %21 = arith.truncf %18 : vector<2x8x16xf32> to vector<2x8x16xbf16>
    "tpu.trace_start"() <{level = 10 : i32, message = "bqd,bkd->bqk"}> : () -> ()
    %cst_12 = arith.constant dense<0.000000e+00> : vector<2x8x8xf32>
    %22 = tpu.matmul %20, %21, %cst_12 {dimension_numbers = #tpu.dot_dimension_numbers<[2], [2], [1], [1], [0, 0, 0, 1, 1, 1], [0], [0]>} : vector<2x8x16xbf16>, vector<2x8x16xbf16>, vector<2x8x8xf32> -> vector<2x8x8xf32>
    "tpu.trace_stop"() : () -> ()
    %cst_13 = arith.constant 2.500000e-01 : f32
    %23 = vector.broadcast %cst_13 : f32 to vector<2x8x8xf32>
    %24 = arith.mulf %22, %23 : vector<2x8x8xf32>
    %25 = vector.shape_cast %15 : vector<2x8xf32> to vector<2x1x8xf32>
    %26 = vector.broadcast %25 : vector<2x1x8xf32> to vector<2x8x8xf32>
    %27 = arith.addf %24, %26 : vector<2x8x8xf32>
    %cst_14 = arith.constant dense<0xFF800000> : vector<2x8xf32>
    %28 = vector.multi_reduction <maximumf>, %27, %cst_14 [2] : vector<2x8x8xf32> to vector<2x8xf32>
    %29 = vector.shape_cast %28 : vector<2x8xf32> to vector<2x8x1xf32>
    %30 = vector.broadcast %29 : vector<2x8x1xf32> to vector<2x8x8xf32>
    %31 = arith.subf %27, %30 : vector<2x8x8xf32>
    %32 = math.exp %31 : vector<2x8x8xf32>
    %cst_15 = arith.constant dense<0.000000e+00> : vector<2x8xf32>
    %33 = vector.multi_reduction <add>, %32, %cst_15 [2] : vector<2x8x8xf32> to vector<2x8xf32>
    %34 = vector.shape_cast %33 : vector<2x8xf32> to vector<2x8x1xf32>
    %35 = tpu.reciprocal %34 {approx = true} : vector<2x8x1xf32> -> vector<2x8x1xf32>
    %36 = vector.broadcast %35 : vector<2x8x1xf32> to vector<2x8x8xf32>
    %37 = arith.mulf %32, %36 : vector<2x8x8xf32>
    %38 = arith.truncf %37 : vector<2x8x8xf32> to vector<2x8x8xbf16>
    %39 = arith.truncf %19 : vector<2x8x16xf32> to vector<2x8x16xbf16>
    "tpu.trace_start"() <{level = 10 : i32, message = "bqk,bkd->bqd"}> : () -> ()
    %cst_16 = arith.constant dense<0.000000e+00> : vector<2x8x16xf32>
    %40 = tpu.matmul %38, %39, %cst_16 {dimension_numbers = #tpu.dot_dimension_numbers<[2], [1], [1], [2], [0, 0, 0, 1, 1, 2], [0], [0]>} : vector<2x8x8xbf16>, vector<2x8x16xbf16>, vector<2x8x16xf32> -> vector<2x8x16xf32>
    "tpu.trace_stop"() : () -> ()
    %41 = vector.shape_cast %40 : vector<2x8x16xf32> to vector<16x16xf32>
    %42 = arith.truncf %41 : vector<16x16xf32> to vector<16x16xbf16>
    %c0_17 = arith.constant 0 : index
    %c32 = arith.constant 32 : index
    %c0_18 = arith.constant 0 : index
    %43 = vector.load %arg5[%c0_17, %c32, %c0_18] : memref<1x224x128xbf16, #tpu.memory_space<vmem>>, vector<1x16x128xbf16>
    %44 = vector.shape_cast %43 : vector<1x16x128xbf16> to vector<16x128xbf16>
    %cst_19 = arith.constant dense<0.000000e+00> : vector<16x128xf32>
    %45 = tpu.matmul %42, %44, %cst_19 {dimension_numbers = #tpu.dot_dimension_numbers<[1], [0], [0], [1], [0, 0, 1, 1], [], []>} : vector<16x16xbf16>, vector<16x128xbf16>, vector<16x128xf32> -> vector<16x128xf32>
    %46 = vector.broadcast %16 : vector<1x128xf32> to vector<16x128xf32>
    %47 = arith.addf %46, %45 : vector<16x128xf32>
    %48 = vector.extract_strided_slice %14 {offsets = [0, 0, 16], sizes = [2, 8, 16], strides = [1, 1, 1]} : vector<2x8x128xf32> to vector<2x8x16xf32>
    %49 = vector.extract_strided_slice %14 {offsets = [0, 0, 48], sizes = [2, 8, 16], strides = [1, 1, 1]} : vector<2x8x128xf32> to vector<2x8x16xf32>
    %50 = vector.extract_strided_slice %14 {offsets = [0, 0, 80], sizes = [2, 8, 16], strides = [1, 1, 1]} : vector<2x8x128xf32> to vector<2x8x16xf32>
    %51 = arith.truncf %48 : vector<2x8x16xf32> to vector<2x8x16xbf16>
    %52 = arith.truncf %49 : vector<2x8x16xf32> to vector<2x8x16xbf16>
    "tpu.trace_start"() <{level = 10 : i32, message = "bqd,bkd->bqk"}> : () -> ()
    %cst_20 = arith.constant dense<0.000000e+00> : vector<2x8x8xf32>
    %53 = tpu.matmul %51, %52, %cst_20 {dimension_numbers = #tpu.dot_dimension_numbers<[2], [2], [1], [1], [0, 0, 0, 1, 1, 1], [0], [0]>} : vector<2x8x16xbf16>, vector<2x8x16xbf16>, vector<2x8x8xf32> -> vector<2x8x8xf32>
    "tpu.trace_stop"() : () -> ()
    %cst_21 = arith.constant 2.500000e-01 : f32
    %54 = vector.broadcast %cst_21 : f32 to vector<2x8x8xf32>
    %55 = arith.mulf %53, %54 : vector<2x8x8xf32>
    %56 = vector.shape_cast %15 : vector<2x8xf32> to vector<2x1x8xf32>
    %57 = vector.broadcast %56 : vector<2x1x8xf32> to vector<2x8x8xf32>
    %58 = arith.addf %55, %57 : vector<2x8x8xf32>
    %cst_22 = arith.constant dense<0xFF800000> : vector<2x8xf32>
    %59 = vector.multi_reduction <maximumf>, %58, %cst_22 [2] : vector<2x8x8xf32> to vector<2x8xf32>
    %60 = vector.shape_cast %59 : vector<2x8xf32> to vector<2x8x1xf32>
    %61 = vector.broadcast %60 : vector<2x8x1xf32> to vector<2x8x8xf32>
    %62 = arith.subf %58, %61 : vector<2x8x8xf32>
    %63 = math.exp %62 : vector<2x8x8xf32>
    %cst_23 = arith.constant dense<0.000000e+00> : vector<2x8xf32>
    %64 = vector.multi_reduction <add>, %63, %cst_23 [2] : vector<2x8x8xf32> to vector<2x8xf32>
    %65 = vector.shape_cast %64 : vector<2x8xf32> to vector<2x8x1xf32>
    %66 = tpu.reciprocal %65 {approx = true} : vector<2x8x1xf32> -> vector<2x8x1xf32>
    %67 = vector.broadcast %66 : vector<2x8x1xf32> to vector<2x8x8xf32>
    %68 = arith.mulf %63, %67 : vector<2x8x8xf32>
    %69 = arith.truncf %68 : vector<2x8x8xf32> to vector<2x8x8xbf16>
    %70 = arith.truncf %50 : vector<2x8x16xf32> to vector<2x8x16xbf16>
    "tpu.trace_start"() <{level = 10 : i32, message = "bqk,bkd->bqd"}> : () -> ()
    %cst_24 = arith.constant dense<0.000000e+00> : vector<2x8x16xf32>
    %71 = tpu.matmul %69, %70, %cst_24 {dimension_numbers = #tpu.dot_dimension_numbers<[2], [1], [1], [2], [0, 0, 0, 1, 1, 2], [0], [0]>} : vector<2x8x8xbf16>, vector<2x8x16xbf16>, vector<2x8x16xf32> -> vector<2x8x16xf32>
    "tpu.trace_stop"() : () -> ()
    %72 = vector.shape_cast %71 : vector<2x8x16xf32> to vector<16x16xf32>
    %73 = arith.truncf %72 : vector<16x16xf32> to vector<16x16xbf16>
    %c0_25 = arith.constant 0 : index
    %c48 = arith.constant 48 : index
    %c0_26 = arith.constant 0 : index
    %74 = vector.load %arg5[%c0_25, %c48, %c0_26] : memref<1x224x128xbf16, #tpu.memory_space<vmem>>, vector<1x16x128xbf16>
    %75 = vector.shape_cast %74 : vector<1x16x128xbf16> to vector<16x128xbf16>
    %cst_27 = arith.constant dense<0.000000e+00> : vector<16x128xf32>
    %76 = tpu.matmul %73, %75, %cst_27 {dimension_numbers = #tpu.dot_dimension_numbers<[1], [0], [0], [1], [0, 0, 1, 1], [], []>} : vector<16x16xbf16>, vector<16x128xbf16>, vector<16x128xf32> -> vector<16x128xf32>
    %77 = arith.addf %47, %76 : vector<16x128xf32>
    %78 = vector.extract_strided_slice %77 {offsets = [0, 0], sizes = [16, 32], strides = [1, 1]} : vector<16x128xf32> to vector<16x32xf32>
    %79 = arith.addf %78, %4 : vector<16x32xf32>
    %80 = vector.extract_strided_slice %6 {offsets = [2, 0], sizes = [1, 32], strides = [1, 1]} : vector<8x128xf32> to vector<1x32xf32>
    %81 = vector.extract_strided_slice %6 {offsets = [3, 0], sizes = [1, 32], strides = [1, 1]} : vector<8x128xf32> to vector<1x32xf32>
    %cst_28 = arith.constant dense<0.000000e+00> : vector<16xf32>
    %82 = vector.multi_reduction <add>, %79, %cst_28 [1] : vector<16x32xf32> to vector<16xf32>
    %83 = vector.shape_cast %82 : vector<16xf32> to vector<16x1xf32>
    %cst_29 = arith.constant 3.200000e+01 : f32
    %84 = vector.broadcast %cst_29 : f32 to vector<16x1xf32>
    %85 = arith.divf %83, %84 : vector<16x1xf32>
    %86 = vector.broadcast %85 : vector<16x1xf32> to vector<16x32xf32>
    %87 = arith.subf %79, %86 : vector<16x32xf32>
    %88 = arith.mulf %87, %87 : vector<16x32xf32>
    %cst_30 = arith.constant dense<0.000000e+00> : vector<16xf32>
    %89 = vector.multi_reduction <add>, %88, %cst_30 [1] : vector<16x32xf32> to vector<16xf32>
    %90 = vector.shape_cast %89 : vector<16xf32> to vector<16x1xf32>
    %cst_31 = arith.constant 3.200000e+01 : f32
    %91 = vector.broadcast %cst_31 : f32 to vector<16x1xf32>
    %92 = arith.divf %90, %91 : vector<16x1xf32>
    %93 = vector.broadcast %85 : vector<16x1xf32> to vector<16x32xf32>
    %94 = arith.subf %79, %93 : vector<16x32xf32>
    %cst_32 = arith.constant 9.99999996E-13 : f32
    %95 = vector.broadcast %cst_32 : f32 to vector<16x1xf32>
    %96 = arith.addf %92, %95 : vector<16x1xf32>
    %97 = math.rsqrt %96 : vector<16x1xf32>
    %98 = vector.broadcast %97 : vector<16x1xf32> to vector<16x32xf32>
    %99 = arith.mulf %94, %98 : vector<16x32xf32>
    %100 = vector.broadcast %80 : vector<1x32xf32> to vector<16x32xf32>
    %101 = arith.mulf %99, %100 : vector<16x32xf32>
    %102 = vector.broadcast %81 : vector<1x32xf32> to vector<16x32xf32>
    %103 = arith.addf %101, %102 : vector<16x32xf32>
    %104 = arith.truncf %103 : vector<16x32xf32> to vector<16x32xbf16>
    %c0_33 = arith.constant 0 : index
    %c64 = arith.constant 64 : index
    %c0_34 = arith.constant 0 : index
    %105 = vector.load %arg5[%c0_33, %c64, %c0_34] : memref<1x224x128xbf16, #tpu.memory_space<vmem>>, vector<1x32x128xbf16>
    %106 = vector.shape_cast %105 : vector<1x32x128xbf16> to vector<32x128xbf16>
    %cst_35 = arith.constant dense<0.000000e+00> : vector<16x128xf32>
    %107 = tpu.matmul %104, %106, %cst_35 {dimension_numbers = #tpu.dot_dimension_numbers<[1], [0], [0], [1], [0, 0, 1, 1], [], []>} : vector<16x32xbf16>, vector<32x128xbf16>, vector<16x128xf32> -> vector<16x128xf32>
    %108 = vector.extract_strided_slice %6 {offsets = [4, 0], sizes = [1, 128], strides = [1, 1]} : vector<8x128xf32> to vector<1x128xf32>
    %109 = vector.broadcast %108 : vector<1x128xf32> to vector<16x128xf32>
    %110 = arith.addf %107, %109 : vector<16x128xf32>
    %111 = arith.mulf %110, %110 : vector<16x128xf32>
    %112 = arith.mulf %110, %111 : vector<16x128xf32>
    %cst_36 = arith.constant 4.471500e-02 : f32
    %113 = vector.broadcast %cst_36 : f32 to vector<16x128xf32>
    %114 = arith.mulf %113, %112 : vector<16x128xf32>
    %115 = arith.addf %110, %114 : vector<16x128xf32>
    %cst_37 = arith.constant 0.797884583 : f32
    %116 = vector.broadcast %cst_37 : f32 to vector<16x128xf32>
    %117 = arith.mulf %116, %115 : vector<16x128xf32>
    %118 = math.tanh %117 : vector<16x128xf32>
    %cst_38 = arith.constant 1.000000e+00 : f32
    %119 = vector.broadcast %cst_38 : f32 to vector<16x128xf32>
    %120 = arith.addf %119, %118 : vector<16x128xf32>
    %cst_39 = arith.constant 5.000000e-01 : f32
    %121 = vector.broadcast %cst_39 : f32 to vector<16x128xf32>
    %122 = arith.mulf %121, %120 : vector<16x128xf32>
    %123 = arith.mulf %110, %122 : vector<16x128xf32>
    %124 = arith.truncf %123 : vector<16x128xf32> to vector<16x128xbf16>
    %c0_40 = arith.constant 0 : index
    %c96 = arith.constant 96 : index
    %c0_41 = arith.constant 0 : index
    %125 = vector.load %arg5[%c0_40, %c96, %c0_41] : memref<1x224x128xbf16, #tpu.memory_space<vmem>>, vector<1x128x128xbf16>
    %126 = vector.shape_cast %125 : vector<1x128x128xbf16> to vector<128x128xbf16>
    %cst_42 = arith.constant dense<0.000000e+00> : vector<16x128xf32>
    %127 = tpu.matmul %124, %126, %cst_42 {dimension_numbers = #tpu.dot_dimension_numbers<[1], [0], [0], [1], [0, 0, 1, 1], [], []>} : vector<16x128xbf16>, vector<128x128xbf16>, vector<16x128xf32> -> vector<16x128xf32>
    %128 = vector.extract_strided_slice %6 {offsets = [5, 0], sizes = [1, 128], strides = [1, 1]} : vector<8x128xf32> to vector<1x128xf32>
    %129 = vector.broadcast %128 : vector<1x128xf32> to vector<16x128xf32>
    %130 = arith.addf %127, %129 : vector<16x128xf32>
    %131 = vector.extract_strided_slice %130 {offsets = [0, 0], sizes = [16, 32], strides = [1, 1]} : vector<16x128xf32> to vector<16x32xf32>
    %132 = arith.addf %131, %103 : vector<16x32xf32>
    %133 = vector.extract_strided_slice %6 {offsets = [6, 0], sizes = [1, 32], strides = [1, 1]} : vector<8x128xf32> to vector<1x32xf32>
    %134 = vector.extract_strided_slice %6 {offsets = [7, 0], sizes = [1, 32], strides = [1, 1]} : vector<8x128xf32> to vector<1x32xf32>
    %cst_43 = arith.constant dense<0.000000e+00> : vector<16xf32>
    %135 = vector.multi_reduction <add>, %132, %cst_43 [1] : vector<16x32xf32> to vector<16xf32>
    %136 = vector.shape_cast %135 : vector<16xf32> to vector<16x1xf32>
    %cst_44 = arith.constant 3.200000e+01 : f32
    %137 = vector.broadcast %cst_44 : f32 to vector<16x1xf32>
    %138 = arith.divf %136, %137 : vector<16x1xf32>
    %139 = vector.broadcast %138 : vector<16x1xf32> to vector<16x32xf32>
    %140 = arith.subf %132, %139 : vector<16x32xf32>
    %141 = arith.mulf %140, %140 : vector<16x32xf32>
    %cst_45 = arith.constant dense<0.000000e+00> : vector<16xf32>
    %142 = vector.multi_reduction <add>, %141, %cst_45 [1] : vector<16x32xf32> to vector<16xf32>
    %143 = vector.shape_cast %142 : vector<16xf32> to vector<16x1xf32>
    %cst_46 = arith.constant 3.200000e+01 : f32
    %144 = vector.broadcast %cst_46 : f32 to vector<16x1xf32>
    %145 = arith.divf %143, %144 : vector<16x1xf32>
    %146 = vector.broadcast %138 : vector<16x1xf32> to vector<16x32xf32>
    %147 = arith.subf %132, %146 : vector<16x32xf32>
    %cst_47 = arith.constant 9.99999996E-13 : f32
    %148 = vector.broadcast %cst_47 : f32 to vector<16x1xf32>
    %149 = arith.addf %145, %148 : vector<16x1xf32>
    %150 = math.rsqrt %149 : vector<16x1xf32>
    %151 = vector.broadcast %150 : vector<16x1xf32> to vector<16x32xf32>
    %152 = arith.mulf %147, %151 : vector<16x32xf32>
    %153 = vector.broadcast %133 : vector<1x32xf32> to vector<16x32xf32>
    %154 = arith.mulf %152, %153 : vector<16x32xf32>
    %155 = vector.broadcast %134 : vector<1x32xf32> to vector<16x32xf32>
    %156 = arith.addf %154, %155 : vector<16x32xf32>
    %c0_48 = arith.constant 0 : index
    %c0_49 = arith.constant 0 : index
    %157 = vector.load %arg8[%c0_48, %c0_49] : memref<16x32xf32, #tpu.memory_space<vmem>>, vector<16x32xf32>
    tpu.vector_store %arg8[%c0_48, %c0_49], %156 {strides = array<i32>} : memref<16x32xf32, #tpu.memory_space<vmem>>, vector<16x32xf32>,
    %c1_i32 = arith.constant 1 : i32
    %158 = arith.cmpi eq, %arg0, %c1_i32 : i32
    %159 = arith.extui %158 : i1 to i32
    %c0_i32_50 = arith.constant 0 : i32
    %160 = arith.cmpi ne, %159, %c0_i32_50 : i32
    scf.if %160 {
      %161 = vector.shape_cast %156 : vector<16x32xf32> to vector<2x8x32xf32>
      %162 = vector.extract_strided_slice %161 {offsets = [0, 0, 0], sizes = [2, 1, 32], strides = [1, 1, 1]} : vector<2x8x32xf32> to vector<2x1x32xf32>
      %163 = vector.shape_cast %162 : vector<2x1x32xf32> to vector<2x32xf32>
      %164 = arith.truncf %163 : vector<2x32xf32> to vector<2x32xbf16>
      %c0_51 = arith.constant 0 : index
      %c0_52 = arith.constant 0 : index
      %165 = vector.load %arg4[%c0_51, %c0_52] : memref<160x128xbf16, #tpu.memory_space<vmem>>, vector<32x128xbf16>
      %cst_53 = arith.constant dense<0.000000e+00> : vector<2x128xf32>
      %166 = tpu.matmul %164, %165, %cst_53 {dimension_numbers = #tpu.dot_dimension_numbers<[1], [0], [0], [1], [0, 0, 1, 1], [], []>} : vector<2x32xbf16>, vector<32x128xbf16>, vector<2x128xf32> -> vector<2x128xf32>
      %167 = vector.extract_strided_slice %0 {offsets = [2, 0], sizes = [1, 128], strides = [1, 1]} : vector<6x128xf32> to vector<1x128xf32>
      %168 = vector.broadcast %167 : vector<1x128xf32> to vector<2x128xf32>
      %169 = arith.addf %166, %168 : vector<2x128xf32>
      %170 = math.tanh %169 : vector<2x128xf32>
      %171 = vector.extract_strided_slice %0 {offsets = [4, 0], sizes = [2, 128], strides = [1, 1]} : vector<6x128xf32> to vector<2x128xf32>
      %172 = arith.mulf %170, %171 : vector<2x128xf32>
      %173 = arith.truncf %172 : vector<2x128xf32> to vector<2x128xbf16>
      %c32_54 = arith.constant 32 : index
      %c0_55 = arith.constant 0 : index
      %174 = vector.load %arg4[%c32_54, %c0_55] : memref<160x128xbf16, #tpu.memory_space<vmem>>, vector<128x128xbf16>
      %cst_56 = arith.constant dense<0.000000e+00> : vector<2x128xf32>
      %175 = tpu.matmul %173, %174, %cst_56 {dimension_numbers = #tpu.dot_dimension_numbers<[1], [0], [0], [1], [0, 0, 1, 1], [], []>} : vector<2x128xbf16>, vector<128x128xbf16>, vector<2x128xf32> -> vector<2x128xf32>
      %176 = vector.extract_strided_slice %0 {offsets = [3, 0], sizes = [1, 128], strides = [1, 1]} : vector<6x128xf32> to vector<1x128xf32>
      %177 = vector.broadcast %176 : vector<1x128xf32> to vector<2x128xf32>
      %178 = arith.addf %175, %177 : vector<2x128xf32>
      %c0_57 = arith.constant 0 : index
      %c0_58 = arith.constant 0 : index
      %179 = vector.load %arg7[%c0_57, %c0_58] : memref<2x128xf32, #tpu.memory_space<vmem>>, vector<2x128xf32>
      tpu.vector_store %arg7[%c0_57, %c0_58], %178 {strides = array<i32>} : memref<2x128xf32, #tpu.memory_space<vmem>>, vector<2x128xf32>,
    } else {
    }
    return
  }
  func.func @transform_0(%arg0: i32) -> (i32, i32) {
    %c0_i32 = arith.constant 0 : i32
    %c0_i32_0 = arith.constant 0 : i32
    %c0_i32_1 = arith.constant 0 : i32
    return %c0_i32, %c0_i32_0 : i32, i32
  }
  func.func @transform_1(%arg0: i32) -> (i32, i32) {
    %c0_i32 = arith.constant 0 : i32
    %c0_i32_0 = arith.constant 0 : i32
    %c0_i32_1 = arith.constant 0 : i32
    return %c0_i32, %c0_i32_0 : i32, i32
  }
  func.func @transform_2(%arg0: i32) -> (i32, i32) {
    %c0_i32 = arith.constant 0 : i32
    %c0_i32_0 = arith.constant 0 : i32
    %c0_i32_1 = arith.constant 0 : i32
    return %c0_i32, %c0_i32_0 : i32, i32
  }
  func.func @transform_3(%arg0: i32) -> (i32, i32) {
    %c0_i32 = arith.constant 0 : i32
    %c0_i32_0 = arith.constant 0 : i32
    %c0_i32_1 = arith.constant 0 : i32
    return %c0_i32, %c0_i32_0 : i32, i32
  }
  func.func @transform_4(%arg0: i32) -> (i32, i32, i32) {
    %c0_i32 = arith.constant 0 : i32
    %c0_i32_0 = arith.constant 0 : i32
    %c0_i32_1 = arith.constant 0 : i32
    return %arg0, %c0_i32, %c0_i32_0 : i32, i32, i32
  }
  func.func @transform_5(%arg0: i32) -> (i32, i32, i32) {
    %c0_i32 = arith.constant 0 : i32
    %c0_i32_0 = arith.constant 0 : i32
    %c0_i32_1 = arith.constant 0 : i32
    return %arg0, %c0_i32, %c0_i32_0 : i32, i32, i32
  }
  func.func @transform_6(%arg0: i32) -> (i32, i32) {
    %c0_i32 = arith.constant 0 : i32
    %c0_i32_0 = arith.constant 0 : i32
    %c0_i32_1 = arith.constant 0 : i32
    return %c0_i32, %c0_i32_0 : i32, i32
  }
}

</mosaic_0001>

<bundles_post_ra>
// kernel: bert_extraction_forward.1
= control target key start
LH: loop header
LB: loop body
LE: loop exit
PB: predicated region body
PF: predicated region fallthrough
CT: control target
= control target key end

     0   :  { %11 = vsyncpa [#allocation4], 0  ;;  %s1886_s21 = smov 0   ;;  %s2147_s0 = inlined_call_operand.vmem [shape: f32[16,32], index: 0, kind: input, shape index: {}]   ;;  %s2148_s1 = inlined_call_operand.vmem [shape: f32[2,8], index: 1, kind: input, shape index: {}]   ;;  %s2149_s2 = inlined_call_operand.vmem [shape: f32[6,128], index: 2, kind: input, shape index: {}]   ;;  %s2150_s3 = inlined_call_operand.vmem [shape: bf16[160,128], index: 3, kind: input, shape index: {}]   ;;  %s2151_s4 = inlined_call_operand.vmem [shape: bf16[2,224,128], index: 4, kind: input, shape index: {}]   ;;  %s2152_s5 = inlined_call_operand.vmem [shape: f32[2,8,128], index: 5, kind: input, shape index: {}]   ;;  %s2153_s6 = inlined_call_operand.hbm [shape: f32[2,128], index: 6, kind: output, shape index: {}]  }
   0x1 LB: > { %s1892_s22 = sadd.s32 4294967295, %s1838_s21   ;;  %p1502_p0 = scmp.ge.s32.totalorder %s1838_s21, 1  ;;  %s1838_s21 = sphi %s1886_s21, %s17_s21  }
   0x2   : > { %p217_p1 = scmp.lt.s32.totalorder %s1838_s21, 3 }
   0x4   : > { %p218_p2 = pnand %p1502_p0, %p217_p1 }
   0x5   : > { %p246_p3 = scmp.lt.s32.totalorder (!%p218_p2), %s1892_s22, 1  ;;  %p1505_p4 = scmp.ne.s32.totalorder (!%p218_p2), %s1892_s22, 0 }
   0x6   : > { %221 = sbr.rel (%p218_p2) target bundleno = 3776 (0xec0), region = 44 }
   0xb   : > { %v1900_v0 = vld [vmem:[%s2149_s2] sm:$0x3f]  ;;  %s247_s25 = scalar_select %p246_p3, %s1892_s22, 1 }
   0xc   : > { %260 = sbr.rel (%p1505_p4) target bundleno = 331 (0x14b), region = 48 }
   0xd   : > { %s1720_s26 = smul.u32 112, %s247_s25  ;;  %s1504_s27 = sshll.u32 %s247_s25, 3 }
   0xe   : > { %s1906_s30 = scalar_lea.vmem %s2152_s5, %s1504_s27 }
   0xf   : > { %s1911_s9 = scalar_lea.vmem %s2151_s4, %s1720_s26 }
  0x11   : > { %v261_v1 = vld [vmem:[%s2147_s0] sm:$0xff]  ;;  %vm263_vm0 = vcmask 261120   ;;  %v262_v2 = vld [vmem:[%s2147_s0 + $0x8] sm:$0xff]  ;;  %v291_v19 = vlaneseq }
  0x12   : > { %v264_v3 = vsel %vm263_vm0, %v261_v1, 0.0  ;;  %v267_v4 = vsel %vm263_vm0, %v262_v2, 0.0 }
  0x13   : > { %265 = vadd.xlane.f32.xlu0 %v264_v3  ;;  %v292_v22 = vshrl.u32 %v291_v19, 7 }
  0x15   : > { %v293_v23 = vsub.s32 0, %v292_v22  ;;  %v299_v24 = vsub.s32 1, %v292_v22 }
  0x17   : > { %268 = vadd.xlane.f32.xlu0 %v267_v4  ;;  %v294_v25 = vrot.slane %v1900_v0, %v293_v23  ;;  %v300_v27 = vrot.slane %v1900_v0, %v299_v24 }
  0x9c   : > { %v266_v5 = vpop.xlane.xlu0 %265 }
  0x9d   : > { %v271_v6 = vmul.f32 0.03125, %v266_v5 }
  0x9f   : > { %v273_v7 = vsub.f32 %v261_v1, %v271_v6 }
  0xa0   : > { %v269_v8 = vpop.xlane.xlu0 %268 }
  0xa1   : > { %v272_v9 = vmul.f32 0.03125, %v269_v8  ;;  %v275_v10 = vmul.f32 %v273_v7, %v273_v7 }
  0xa3   : > { %v274_v11 = vsub.f32 %v262_v2, %v272_v9  ;;  %v277_v12 = vsel %vm263_vm0, %v275_v10, 0.0 }
  0xa4   : > { %278 = vadd.xlane.f32.xlu1 %v277_v12 }
  0xa5   : > { %v276_v13 = vmul.f32 %v274_v11, %v274_v11 }
  0xa7   : > { %v280_v14 = vsel %vm263_vm0, %v276_v13, 0.0 }
  0xa8   : > { %281 = vadd.xlane.f32.xlu1 %v280_v14 }
 0x12d   : > { %v279_v15 = vpop.xlane.xlu1 %278 }
 0x12e   : > { %v283_v16 = vmul.f32 0.03125, %v279_v15 }
 0x130   : > { %v285_v17 = vadd.f32 1e-12, %v283_v16 }
 0x131   : > { %v282_v18 = vpop.xlane.xlu1 %281 }
 0x132   : > { %1746 = vrsqrt.f32 %v285_v17  ;;  %v284_v20 = vmul.f32 0.03125, %v282_v18 }
 0x134   : > { %v286_v21 = vadd.f32 1e-12, %v284_v20 }
 0x136   : > { %1748 = vrsqrt.f32 %v286_v21 }
 0x13f   : > { %v1747_v26 = vpop.eup %1746 }
 0x140   : > { %v289_v28 = vmul.f32 %v1747_v26, %v273_v7 }
 0x142   : > { %v295_v29 = vmul.f32 %v294_v25, %v289_v28 }
 0x143   : > { %v1749_v30 = vpop.eup %1748 }
 0x144   : > { %v301_v31 = vadd.f32 %v300_v27, %v295_v29  ;;  %v290_v32 = vmul.f32 %v1749_v30, %v274_v11 }
 0x146   : > { %303 = vst.msk [vmem:[#allocation2] sm:$0xff] %vm263_vm0, %v301_v31  ;;  %v296_v33 = vmul.f32 %v294_v25, %v290_v32 }
 0x148   : > { %v302_v34 = vadd.f32 %v300_v27, %v296_v33 }
 0x14a   : > { %304 = vst.msk [vmem:[#allocation2 + $0x8] sm:$0xff] %vm263_vm0, %v302_v34 }
 0x14b PF: > { %v1750_v35 = vld [vmem:[%s1911_s9 + $0x8] sm:$0xff]   ;;  %v1840_v36 = vmov 0.0   ;;  %v1751_v37 = vld [vmem:[%s1911_s9] sm:$0xff]   ;;  %vm1841_vm1 = vmmov 0   ;;  %vm329_vm2 = vcmask 261120   ;;  %v313_v41 = vlaneseq  ;;  %s1842_s14 = smov 96  }
 0x14c   : > { %1596 = vmatprep.subr.bf16.mxu1 %v1840_v36  ;;  %1622 = vmatprep.subr.bf16.mxu0 %v1840_v36  ;;  %v1951_v44 = vld [vmem:[%s1906_s30] sm:$0xff]  ;;  %vm380_vm3 = vcmask 130048   ;;  %v1843_v58 = vmov 1966171168   ;;  %vm513_vm4 = vcmask 64512   ;;  %s1844_s17 = smov 64  }
 0x14d   : > { %1597 = vmatpush3.bf16.msra.mxu1 %v1750_v35  ;;  %1600 = vmatprep.mubr.msk.bf16.mxu1 %vm1841_vm1, %v1840_v36  ;;  %v1934_v38 = vld [vmem:[#allocation2] sm:$0xff]  ;;  %v1947_v42 = vshrl.u32 %v313_v41, 7  ;;  %v488_v59 = vunpack.c.l.s4 %v1843_v58  ;;  %vm543_vm5 = vcmask 1043456   ;;  %s1845_s18 = smov 112   ;;  %s1846_s19 = smov 80  }
 0x14e   : > { %1598 = vmatprep.subr.bf16.mxu1 %v1840_v36  ;;  %1624 = vmatprep.mubr.msk.bf16.mxu0 %vm1841_vm1, %v1840_v36  ;;  %v1511_v62 = vld.sshfl [vmem:[%s2148_s1] sm:$0x11 pattern:$0x75316420]  ;;  %s1847_s20 = smov 48   ;;  %p1533_p5 = scmp.ne.s32.totalorder %s1892_s22, 1 }
 0x14f   : > { %v315_v43 = vsub.s32 0, %v1947_v42  ;;  %v489_v60 = vunpack.c.0.s8 %v488_v59  ;;  %v486_v1 = vcombine.high %v1511_v62, %v1511_v62 }
 0x151   : > { %v1936_v39 = vld [vmem:[#allocation2 + $0x8] sm:$0xff]  ;;  %1599 = vmatpush3.bf16.msra.mxu1 %v1751_v37  ;;  %v316_v45 = vrot.slane %v1951_v44, %v315_v43  ;;  %v492_v61 = vsub.s32 %v489_v60, %v1947_v42 }
 0x152   : > { %v308_v40 = vpack.c.bf16 %v1936_v39, %v1934_v38  ;;  %1604 = vmatprep.subr.bf16.mxu1 %v1840_v36 }
 0x153   : > { %v493_v63 = vrot.slane %v1511_v62, %v492_v61  ;;  %v500_v7 = vrot.slane %v486_v1, %v492_v61 }
 0x154   : > { %1601 = vmatmul.mubr.msk.bf16.vlgmr.msra.gmra.mxu1 %vm329_vm2, %v308_v40 }
 0x155   : > { %1606 = vmatprep.mubr.msk.bf16.mxu1 %vm1841_vm1, %v1840_v36  ;;  %v1976_v2 = vrot.slane %v493_v63, %v315_v43  ;;  %v1980_v11 = vrot.slane %v500_v7, %v315_v43 }
 0x214   : > { %v367_v46 = vpop.f32.mrf.mxu1 }
 0x215   : > { %v368_v47 = vadd.f32 %v367_v46, %v316_v45 }
 0x216   : > { %v1602_v48 = vpop.f32.mrf.mxu1 }
 0x217   : > { %v1954_v49 = vpack.c.bf16 %v368_v47, %v368_v47 }
 0x218   : > { %v370_v50 = vpop.f32.mrf.mxu1 }
 0x219   : > { %v371_v51 = vadd.f32 %v370_v50, %v316_v45  ;;  %378 = vrot.lane.b32.xlu0 %v1954_v49, %s1842_s14  ;;  %v1752_v50 = vld [vmem:[%s1911_s9 + $0x10] sm:$0xff]  }
 0x21a   : > { %v1603_v52 = vpop.f32.mrf.mxu1 }
 0x21b   : > { %v1957_v53 = vpack.c.bf16 %v371_v51, %v371_v51 }
 0x21d   : > { %428 = vrot.lane.b32.xlu0 %v1957_v53, %s1842_s14 }
 0x28b   : > { %v379_v54 = vpop.permute.xlu0 %378 }
 0x28c   : > { %v385_v55 = vsel %vm380_vm3, %v379_v54, 0 }
 0x28d   : > { %1605 = vmatpush3.bf16.xpose.msra.mxu1 %v385_v55 }
 0x28e   : > { %1610 = vmatprep.subr.bf16.mxu1 %v1840_v36 }
 0x28f   : > { %v429_v56 = vpop.permute.xlu0 %428 }
 0x290   : > { %v434_v57 = vsel %vm380_vm3, %v429_v56, 0 }
 0x294   : > { %1607 = vmatmul.mubr.msk.bf16.vlgmr.msra.gmra.mxu1 %vm380_vm3, %v1954_v49 }
 0x295   : > { %1611 = vmatpush3.bf16.xpose.msra.mxu1 %v434_v57  ;;  %1612 = vmatprep.mubr.msk.bf16.mxu1 %vm1841_vm1, %v1840_v36 }
 0x296   : > { %1616 = vmatprep.subr.bf16.mxu1 %v1840_v36 }
 0x29c   : > { %1613 = vmatmul.mubr.msk.bf16.vlgmr.msra.gmra.mxu1 %vm380_vm3, %v1957_v53 }
 0x29d   : > { %1618 = vmatprep.mubr.msk.bf16.mxu1 %vm1841_vm1, %v1840_v36 }
 0x354   : > { %v421_v3 = vpop.f32.mrf.mxu1 }
 0x355   : > { %v476_v4 = vmul.f32 0.25, %v421_v3 }
 0x356   : > { %v1608_v5 = vpop.f32.mrf.mxu1 }
 0x357   : > { %v511_v6 = vadd.f32 %v1976_v2, %v476_v4 }
 0x358   : > { %v424_v8 = vpop.f32.mrf.mxu1 }
 0x359   : > { %v514_v9 = vsel %vm513_vm4, %v511_v6, -inf }
 0x35a   : > { %515 = vmax.xlane.f32.xlu1 %v514_v9  ;;  %v1609_v10 = vpop.f32.mrf.mxu1 }
 0x35c   : > { %v470_v12 = vpop.f32.mrf.mxu1 }
 0x35d   : > { %v477_v13 = vmul.f32 0.25, %v470_v12 }
 0x35e   : > { %v1614_v14 = vpop.f32.mrf.mxu1 }
 0x35f   : > { %v512_v15 = vadd.f32 %v1980_v11, %v477_v13 }
 0x360   : > { %v473_v16 = vpop.f32.mrf.mxu1 }
 0x361   : > { %v517_v17 = vsel %vm513_vm4, %v512_v15, -inf }
 0x362   : > { %518 = vmax.xlane.f32.xlu1 %v517_v17  ;;  %v1615_v18 = vpop.f32.mrf.mxu1 }
 0x373   : > { %538 = vrot.lane.b32.xlu1 %v1954_v49, %s1844_s17 }
 0x3e3   : > { %v516_v19 = vpop.xlane.xlu1 %515 }
 0x3e4   : > { %v520_v20 = vsub.f32 %v511_v6, %v516_v19 }
 0x3e6   : > { %v522_v21 = vmul.f32 1.442695, %v520_v20 }
 0x3e8   : > { %1764 = vpow2.f32 %v522_v21 }
 0x3eb   : > { %v519_v22 = vpop.xlane.xlu1 %518 }
 0x3ec   : > { %v521_v23 = vsub.f32 %v512_v15, %v519_v22 }
 0x3ee   : > { %v524_v24 = vmul.f32 1.442695, %v521_v23 }
 0x3ef   : > { %v539_v25 = vpop.permute.xlu1 %538 }
 0x3f0   : > { %1766 = vpow2.f32 %v524_v24  ;;  %v545_v26 = vsel %vm543_vm5, %v539_v25, 0 }
 0x3f1   : > { %1617 = vmatpush3.bf16.msra.mxu1 %v545_v26 }
 0x3f2   : > { %1628 = vmatprep.subr.bf16.mxu1 %v1840_v36 }
 0x3f5   : > { %v1765_v27 = vpop.eup %1764 }
 0x3f6   : > { %v526_v28 = vsel %vm513_vm4, %v1765_v27, 0.0 }
 0x3f7   : > { %527 = vadd.xlane.f32.xlu0 %v526_v28 }
 0x3fd   : > { %v1767_v29 = vpop.eup %1766 }
 0x3fe   : > { %v529_v30 = vsel %vm513_vm4, %v1767_v29, 0.0 }
 0x3ff   : > { %530 = vadd.xlane.f32.xlu1 %v529_v30 }
 0x40d   : > { %694 = vrot.lane.b32.xlu0 %v1954_v49, %s1845_s18 }
 0x410   : > { %587 = vrot.lane.b32.xlu1 %v1957_v53, %s1844_s17 }
 0x414   : > { %696 = vrot.lane.b32.xlu1 %v1954_v49, %s1846_s19 }
 0x418   : > { %746 = vrot.lane.b32.xlu1 %v1957_v53, %s1846_s19 }
 0x41c   : > { %744 = vrot.lane.b32.xlu1 %v1957_v53, %s1845_s18 }
 0x480   : > { %v528_v31 = vpop.xlane.xlu0 %527 }
 0x481   : > { %1768 = vrcp.f32 %v528_v31 }
 0x484   : > { %v695_v48 = vpop.permute.xlu0 %694 }
 0x488   : > { %v531_v32 = vpop.xlane.xlu1 %530 }
 0x489   : > { %1770 = vrcp.f32 %v531_v32 }
 0x48c   : > { %v588_v33 = vpop.permute.xlu1 %587 }
 0x48d   : > { %v593_v34 = vsel %vm543_vm5, %v588_v33, 0 }
 0x48e   : > { %v1769_v35 = vpop.eup %1768  ;;  %1623 = vmatpush3.bf16.msra.mxu0 %v593_v34 }
 0x48f   : > { %v534_v37 = vmul.f32 %v1769_v35, %v1765_v27  ;;  %1634 = vmatprep.subr.bf16.mxu0 %v1840_v36 }
 0x490   : > { %v697_v45 = vpop.permute.xlu1 %696 }
 0x491   : > { %v536_v40 = vpack.c.bf16 %v534_v37, %v534_v37  ;;  %v702_v47 = vsel %vm380_vm3, %v697_v45, 0 }
 0x493   : > { %1619 = vmatmul.mubr.msk.bf16.vlgmr.msra.gmra.mxu1 %vm513_vm4, %v536_v40 }
 0x494   : > { %1630 = vmatprep.mubr.msk.bf16.mxu1 %vm1841_vm1, %v1840_v36  ;;  %1629 = vmatpush3.bf16.msra.mxu1 %v1752_v50  ;;  %v747_v56 = vpop.permute.xlu1 %746 }
 0x495   : > { %1640 = vmatprep.subr.bf16.mxu1 %v1840_v36  ;;  %v752_v60 = vsel %vm380_vm3, %v747_v56, 0  ;;  %v690_v56 = vsub.s32 1, %v1947_v42 }
 0x496   : > { %v1771_v41 = vpop.eup %1770 }
 0x497   : > { %v535_v43 = vmul.f32 %v1771_v41, %v1767_v29 }
 0x498   : > { %v745_v3 = vpop.permute.xlu1 %744 }
 0x499   : > { %v537_v46 = vpack.c.bf16 %v535_v43, %v535_v43  ;;  %v1753_v43 = vld [vmem:[%s1911_s9 + $0x18] sm:$0xff]  }
 0x49b   : > { %1625 = vmatmul.mubr.msk.bf16.vlgmr.msra.gmra.mxu0 %vm513_vm4, %v537_v46 }
 0x49c   : > { %1635 = vmatpush3.bf16.xpose.msra.mxu0 %v702_v47  ;;  %1636 = vmatprep.mubr.msk.bf16.mxu0 %vm1841_vm1, %v1840_v36 }
 0x49d   : > { %1646 = vmatprep.subr.bf16.mxu0 %v1840_v36 }
 0x4a3   : > { %1637 = vmatmul.mubr.msk.bf16.vlgmr.msra.gmra.mxu0 %vm380_vm3, %v695_v48 }
 0x4a4   : > { %1648 = vmatprep.mubr.msk.bf16.mxu0 %vm1841_vm1, %v1840_v36 }
 0x553   : > { %v581_v51 = vpop.f32.mrf.mxu1 }
 0x555   : > { %v1620_v52 = vpop.f32.mrf.mxu1 }
 0x557   : > { %v584_v54 = vpop.f32.mrf.mxu1 }
 0x559   : > { %v1621_v55 = vpop.f32.mrf.mxu1 }
 0x55b   : > { %v629_v57 = vpop.f32.mrf.mxu0 }
 0x55c   : > { %v635_v58 = vpack.c.bf16 %v629_v57, %v581_v51  ;;  %v691_v57 = vrot.slane %v1951_v44, %v690_v56 }
 0x55d   : > { %v1626_v59 = vpop.f32.mrf.mxu0 }
 0x55e   : > { %1631 = vmatmul.mubr.msk.bf16.vlgmr.msra.gmra.mxu1 %vm380_vm3, %v635_v58 }
 0x55f   : > { %1641 = vmatpush3.bf16.xpose.msra.mxu1 %v752_v60  ;;  %v632_v61 = vpop.f32.mrf.mxu0  ;;  %1642 = vmatprep.mubr.msk.bf16.mxu1 %vm1841_vm1, %v1840_v36 }
 0x560   : > { %1652 = vmatprep.subr.bf16.mxu1 %v1840_v36 }
 0x561   : > { %v1627_v62 = vpop.f32.mrf.mxu0 }
 0x563   : > { %v738_v63 = vpop.f32.mrf.mxu0 }
 0x564   : > { %v794_v1 = vmul.f32 0.25, %v738_v63 }
 0x565   : > { %v1638_v4 = vpop.f32.mrf.mxu0 }
 0x566   : > { %1643 = vmatmul.mubr.msk.bf16.vlgmr.msra.gmra.mxu1 %vm380_vm3, %v745_v3  ;;  %v796_v5 = vadd.f32 %v794_v1, %v1976_v2 }
 0x567   : > { %v741_v6 = vpop.f32.mrf.mxu0  ;;  %1654 = vmatprep.mubr.msk.bf16.mxu1 %vm1841_vm1, %v1840_v36 }
 0x568   : > { %v798_v7 = vsel %vm513_vm4, %v796_v5, -inf }
 0x569   : > { %799 = vmax.xlane.f32.xlu1 %v798_v7  ;;  %v1639_v8 = vpop.f32.mrf.mxu0 }
 0x5f2   : > { %v800_v9 = vpop.xlane.xlu1 %799 }
 0x5f3   : > { %v804_v10 = vsub.f32 %v796_v5, %v800_v9 }
 0x5f5   : > { %v806_v12 = vmul.f32 1.442695, %v804_v10 }
 0x5f7   : > { %1772 = vpow2.f32 %v806_v12 }
 0x604   : > { %v1773_v13 = vpop.eup %1772 }
 0x605   : > { %v810_v14 = vsel %vm513_vm4, %v1773_v13, 0.0 }
 0x606   : > { %811 = vadd.xlane.f32.xlu1 %v810_v14 }
 0x61e   : > { %v681_v15 = vpop.f32.mrf.mxu1 }
 0x61f   : > { %v692_v58 = vadd.f32 %v691_v57, %v681_v15 }
 0x620   : > { %v1632_v16 = vpop.f32.mrf.mxu1 }
 0x622   : > { %v684_v17 = vpop.f32.mrf.mxu1 }
 0x623   : > { %v693_v62 = vadd.f32 %v691_v57, %v684_v17 }
 0x624   : > { %v1633_v2 = vpop.f32.mrf.mxu1 }
 0x625   : > { %v1754_v2 = vld [vmem:[%s1911_s9 + $0x28] sm:$0xff]  }
 0x626   : > { %v788_v18 = vpop.f32.mrf.mxu1 }
 0x627   : > { %v795_v19 = vmul.f32 0.25, %v788_v18 }
 0x628   : > { %v1644_v20 = vpop.f32.mrf.mxu1 }
 0x629   : > { %v797_v21 = vadd.f32 %v795_v19, %v1980_v11 }
 0x62a   : > { %v791_v22 = vpop.f32.mrf.mxu1 }
 0x62b   : > { %v801_v23 = vsel %vm513_vm4, %v797_v21, -inf }
 0x62c   : > { %802 = vmax.xlane.f32.xlu0 %v801_v23  ;;  %v1645_v24 = vpop.f32.mrf.mxu1 }
 0x62d   : > { %v1004_v24 = vsub.s32 2, %v1947_v42 }
 0x642   : > { %870 = vrot.lane.b32.xlu0 %v1957_v53, %s1847_s20 }
 0x68f   : > { %v812_v31 = vpop.xlane.xlu1 %811 }
 0x6b5   : > { %v803_v25 = vpop.xlane.xlu0 %802 }
 0x6b6   : > { %v805_v26 = vsub.f32 %v797_v21, %v803_v25 }
 0x6b8   : > { %v808_v27 = vmul.f32 1.442695, %v805_v26 }
 0x6b9   : > { %v871_v28 = vpop.permute.xlu0 %870 }
 0x6ba   : > { %1774 = vpow2.f32 %v808_v27  ;;  %v876_v29 = vsel %vm543_vm5, %v871_v28, 0  ;;  %v1005_v27 = vrot.slane %v1951_v44, %v1004_v24  ;;  %v1010_v28 = vsub.s32 3, %v1947_v42 }
 0x6bb   : > { %1653 = vmatpush3.bf16.msra.mxu1 %v876_v29  ;;  %1776 = vrcp.f32 %v812_v31 }
 0x6bc   : > { %1664 = vmatprep.subr.bf16.mxu1 %v1840_v36  ;;  %v1011_v31 = vrot.slane %v1951_v44, %v1010_v28 }
 0x6c7   : > { %v1775_v30 = vpop.eup %1774 }
 0x6c8   : > { %v813_v11 = vsel %vm513_vm4, %v1775_v30, 0.0  ;;  %v1777_v32 = vpop.eup %1776 }
 0x6c9   : > { %814 = vadd.xlane.f32.xlu1 %v813_v11  ;;  %v818_v33 = vmul.f32 %v1777_v32, %v1773_v13 }
 0x6cb   : > { %v820_v37 = vpack.c.bf16 %v818_v33, %v818_v33 }
 0x6da   : > { %822 = vrot.lane.b32.xlu1 %v1954_v49, %s1847_s20 }
 0x752   : > { %v815_v53 = vpop.xlane.xlu1 %814 }
 0x753   : > { %1778 = vrcp.f32 %v815_v53 }
 0x756   : > { %v823_v34 = vpop.permute.xlu1 %822 }
 0x757   : > { %v828_v35 = vsel %vm543_vm5, %v823_v34, 0 }
 0x758   : > { %1647 = vmatpush3.bf16.msra.mxu0 %v828_v35  ;;  %v1756_v35 = vld [vmem:[%s1911_s9 + $0x68] sm:$0xff]  }
 0x759   : > { %1658 = vmatprep.subr.bf16.mxu0 %v1840_v36 }
 0x75b   : > { %1649 = vmatmul.mubr.msk.bf16.vlgmr.msra.gmra.mxu0 %vm513_vm4, %v820_v37  ;;  %v1757_v37 = vld [vmem:[%s1911_s9 + $0x60] sm:$0xff]  }
 0x75c   : > { %1660 = vmatprep.mubr.msk.bf16.mxu0 %vm1841_vm1, %v1840_v36  ;;  %1659 = vmatpush3.bf16.msra.mxu0 %v1753_v43  ;;  %v1761_v43 = vld [vmem:[%s1911_s9 + $0x40] sm:$0xff]  }
 0x75d   : > { %1672 = vmatprep.subr.bf16.mxu0 %v1840_v36 }
 0x760   : > { %v1779_v49 = vpop.eup %1778 }
 0x761   : > { %v819_v40 = vmul.f32 %v1779_v49, %v1775_v30  ;;  %v1758_v49 = vld [vmem:[%s1911_s9 + $0x58] sm:$0xff]  }
 0x763   : > { %v821_v41 = vpack.c.bf16 %v819_v40, %v819_v40  ;;  %v1759_v40 = vld [vmem:[%s1911_s9 + $0x50] sm:$0xff]  }
 0x765   : > { %1655 = vmatmul.mubr.msk.bf16.vlgmr.msra.gmra.mxu1 %vm513_vm4, %v821_v41  ;;  %v1760_v41 = vld [vmem:[%s1911_s9 + $0x48] sm:$0xff]  }
 0x766   : > { %1668 = vmatprep.mubr.msk.bf16.mxu1 %vm1841_vm1, %v1840_v36  ;;  %1665 = vmatpush3.bf16.msra.mxu1 %v1754_v2 }
 0x767   : > { %1666 = vmatprep.subr.bf16.mxu1 %v1840_v36 }
 0x81b   : > { %v864_v45 = vpop.f32.mrf.mxu0 }
 0x81d   : > { %v1650_v46 = vpop.f32.mrf.mxu0 }
 0x81e   : > { %v1763_v46 = vld [vmem:[%s1911_s9 + $0x30] sm:$0xff]  }
 0x81f   : > { %v867_v47 = vpop.f32.mrf.mxu0 }
 0x820   : > { %v1021_v47 = vsub.s32 4, %v1947_v42 }
 0x821   : > { %v1651_v48 = vpop.f32.mrf.mxu0 }
 0x822   : > { %v1022_v48 = vrot.slane %v1951_v44, %v1021_v47 }
 0x825   : > { %v912_v50 = vpop.f32.mrf.mxu1 }
 0x826   : > { %v918_v51 = vpack.c.bf16 %v912_v50, %v864_v45  ;;  %v1762_v45 = vld [vmem:[%s1911_s9 + $0x38] sm:$0xff]  }
 0x827   : > { %v1656_v52 = vpop.f32.mrf.mxu1 }
 0x828   : > { %1661 = vmatmul.mubr.msk.bf16.vlgmr.msra.gmra.mxu0 %vm380_vm3, %v918_v51 }
 0x829   : > { %v915_v54 = vpop.f32.mrf.mxu1  ;;  %1688 = vmatprep.mubr.msk.bf16.mxu0 %vm1841_vm1, %v1840_v36  ;;  %1673 = vmatpush3.bf16.msra.mxu0 %v1756_v35 }
 0x82a   : > { %1674 = vmatprep.subr.bf16.mxu0 %v1840_v36 }
 0x82b   : > { %v1657_v55 = vpop.f32.mrf.mxu1 }
 0x82d   : > { %1675 = vmatpush3.bf16.msra.mxu0 %v1757_v37 }
 0x82e   : > { %1676 = vmatprep.subr.bf16.mxu0 %v1840_v36 }
 0x831   : > { %1677 = vmatpush3.bf16.msra.mxu0 %v1758_v49 }
 0x832   : > { %1678 = vmatprep.subr.bf16.mxu0 %v1840_v36 }
 0x835   : > { %1679 = vmatpush3.bf16.msra.mxu0 %v1759_v40 }
 0x836   : > { %1680 = vmatprep.subr.bf16.mxu0 %v1840_v36 }
 0x839   : > { %1681 = vmatpush3.bf16.msra.mxu0 %v1760_v41  ;;  %v1237_v41 = vsub.s32 6, %v1947_v42 }
 0x83a   : > { %1682 = vmatprep.subr.bf16.mxu0 %v1840_v36 }
 0x83d   : > { %1683 = vmatpush3.bf16.msra.mxu0 %v1761_v43  ;;  %v1243_v43 = vsub.s32 7, %v1947_v42 }
 0x83e   : > { %1684 = vmatprep.subr.bf16.mxu0 %v1840_v36 }
 0x83f   : > { %v1244_v47 = vrot.slane %v1951_v44, %v1243_v43 }
 0x841   : > { %1685 = vmatpush3.bf16.msra.mxu0 %v1762_v45  ;;  %v1238_v45 = vrot.slane %v1951_v44, %v1237_v41 }
 0x842   : > { %1686 = vmatprep.subr.bf16.mxu0 %v1840_v36 }
 0x845   : > { %1687 = vmatpush3.bf16.msra.mxu0 %v1763_v46 }
 0x8e8   : > { %v964_v59 = vpop.f32.mrf.mxu0 }
 0x8e9   : > { %v971_v60 = vadd.f32 %v964_v59, %v692_v58 }
 0x8ea   : > { %v1662_v61 = vpop.f32.mrf.mxu0 }
 0x8eb   : > { %v973_v63 = vadd.f32 %v971_v60, %v1934_v38 }
 0x8ec   : > { %v967_v1 = vpop.f32.mrf.mxu0 }
 0x8ed   : > { %v972_v3 = vadd.f32 %v967_v1, %v693_v62  ;;  %v975_v4 = vsel %vm329_vm2, %v973_v63, 0.0 }
 0x8ee   : > { %976 = vadd.xlane.f32.xlu1 %v975_v4  ;;  %v1663_v5 = vpop.f32.mrf.mxu0 }
 0x8ef   : > { %v974_v6 = vadd.f32 %v972_v3, %v1936_v39  ;;  %v1755_v39 = vld [vmem:[%s1911_s9 + $0x20] sm:$0xff]  }
 0x8f0   : > { %1667 = vmatpush3.bf16.msra.mxu1 %v1755_v39 }
 0x8f1   : > { %v978_v7 = vsel %vm329_vm2, %v974_v6, 0.0 }
 0x8f2   : > { %979 = vadd.xlane.f32.xlu0 %v978_v7 }
 0x977   : > { %v977_v8 = vpop.xlane.xlu1 %976 }
 0x978   : > { %v982_v9 = vmul.f32 0.03125, %v977_v8 }
 0x97a   : > { %v984_v10 = vsub.f32 %v973_v63, %v982_v9 }
 0x97b   : > { %v980_v12 = vpop.xlane.xlu0 %979 }
 0x97c   : > { %v983_v13 = vmul.f32 0.03125, %v980_v12  ;;  %v986_v14 = vmul.f32 %v984_v10, %v984_v10 }
 0x97e   : > { %v985_v38 = vsub.f32 %v974_v6, %v983_v13  ;;  %v988_v15 = vsel %vm329_vm2, %v986_v14, 0.0  ;;  %v1116_v14 = vsub.s32 5, %v1947_v42 }
 0x97f   : > { %989 = vadd.xlane.f32.xlu1 %v988_v15 }
 0x980   : > { %v987_v16 = vmul.f32 %v985_v38, %v985_v38 }
 0x982   : > { %v991_v17 = vsel %vm329_vm2, %v987_v16, 0.0 }
 0x983   : > { %992 = vadd.xlane.f32.xlu0 %v991_v17 }
 0xa08   : > { %v990_v18 = vpop.xlane.xlu1 %989 }
 0xa09   : > { %v994_v19 = vmul.f32 0.03125, %v990_v18 }
 0xa0b   : > { %v996_v20 = vadd.f32 1e-12, %v994_v19 }
 0xa0c   : > { %v993_v21 = vpop.xlane.xlu0 %992 }
 0xa0d   : > { %1780 = vrsqrt.f32 %v996_v20  ;;  %v995_v22 = vmul.f32 0.03125, %v993_v21 }
 0xa0f   : > { %v997_v23 = vadd.f32 1e-12, %v995_v22 }
 0xa11   : > { %1782 = vrsqrt.f32 %v997_v23 }
 0xa1a   : > { %v1781_v25 = vpop.eup %1780 }
 0xa1b   : > { %v1000_v26 = vmul.f32 %v1781_v25, %v984_v10 }
 0xa1d   : > { %v1006_v11 = vmul.f32 %v1005_v27, %v1000_v26 }
 0xa1e   : > { %v1783_v29 = vpop.eup %1782 }
 0xa1f   : > { %v1001_v30 = vmul.f32 %v1783_v29, %v985_v38  ;;  %v1012_v53 = vadd.f32 %v1011_v31, %v1006_v11  ;;  %v1117_v38 = vrot.slane %v1951_v44, %v1116_v14 }
 0xa21   : > { %v1007_v32 = vmul.f32 %v1005_v27, %v1001_v30 }
 0xa23   : > { %v2059_v33 = vadd.f32 %v1011_v31, %v1007_v32 }
 0xa25   : > { %v1014_v34 = vpack.c.bf16 %v2059_v33, %v1012_v53 }
 0xa27   : > { %1669 = vmatmul.mubr.msk.bf16.vlgmr.msra.gmra.mxu1 %vm329_vm2, %v1014_v34 }
 0xae7   : > { %v1072_v50 = vpop.f32.mrf.mxu1 }
 0xae8   : > { %v1073_v51 = vadd.f32 %v1072_v50, %v1022_v48 }
 0xae9   : > { %v1670_v52 = vpop.f32.mrf.mxu1 }
 0xaea   : > { %v1079_v54 = vmul.f32 %v1073_v51, %v1073_v51 }
 0xaeb   : > { %v1075_v55 = vpop.f32.mrf.mxu1 }
 0xaec   : > { %v1081_v56 = vmul.f32 %v1079_v54, %v1073_v51  ;;  %v1076_v57 = vadd.f32 %v1075_v55, %v1022_v48 }
 0xaed   : > { %v1671_v58 = vpop.f32.mrf.mxu1 }
 0xaee   : > { %v1083_v59 = vmul.f32 0.044715, %v1081_v56  ;;  %v1080_v60 = vmul.f32 %v1076_v57, %v1076_v57 }
 0xaf0   : > { %v1085_v61 = vadd.f32 %v1083_v59, %v1073_v51  ;;  %v1082_v62 = vmul.f32 %v1080_v60, %v1076_v57 }
 0xaf2   : > { %v1087_v63 = vmul.f32 0.7978846, %v1085_v61  ;;  %v1084_v36 = vmul.f32 0.044715, %v1082_v62 }
 0xaf4   : > { %1784 = vtanh.f32 %v1087_v63  ;;  %v1086_v1 = vadd.f32 %v1084_v36, %v1076_v57 }
 0xaf6   : > { %v1088_v3 = vmul.f32 0.7978846, %v1086_v1 }
 0xaf8   : > { %1786 = vtanh.f32 %v1088_v3 }
 0xb01   : > { %v1785_v4 = vpop.eup %1784 }
 0xb02   : > { %v1091_v5 = vadd.f32 1.0, %v1785_v4 }
 0xb04   : > { %v1093_v7 = vmul.f32 0.5, %v1091_v5 }
 0xb05   : > { %v1787_v6 = vpop.eup %1786 }
 0xb06   : > { %v1092_v8 = vadd.f32 1.0, %v1787_v6  ;;  %v1095_v10 = vmul.f32 %v1093_v7, %v1073_v51 }
 0xb08   : > { %v1094_v9 = vmul.f32 0.5, %v1092_v8 }
 0xb0a   : > { %v1096_v12 = vmul.f32 %v1094_v9, %v1076_v57 }
 0xb0c   : > { %v1097_v13 = vpack.c.bf16 %v1096_v12, %v1095_v10 }
 0xb0e   : > { %1689 = vmatmul.mubr.bf16.vlgmr.msra.gmra.mxu0 %v1097_v13 }
 0xbce   : > { %v1200_v15 = vpop.f32.mrf.mxu0 }
 0xbcf   : > { %v1201_v16 = vadd.f32 %v1200_v15, %v1117_v38 }
 0xbd0   : > { %v1690_v17 = vpop.f32.mrf.mxu0 }
 0xbd1   : > { %v1207_v2 = vadd.f32 %v1201_v16, %v1012_v53 }
 0xbd2   : > { %v1203_v39 = vpop.f32.mrf.mxu0 }
 0xbd3   : > { %v1204_v18 = vadd.f32 %v1203_v39, %v1117_v38  ;;  %v1209_v19 = vsel %vm329_vm2, %v1207_v2, 0.0 }
 0xbd4   : > { %1210 = vadd.xlane.f32.xlu1 %v1209_v19  ;;  %v1691_v20 = vpop.f32.mrf.mxu0 }
 0xbd5   : > { %v1208_v21 = vadd.f32 %v1204_v18, %v2059_v33 }
 0xbd7   : > { %v1212_v22 = vsel %vm329_vm2, %v1208_v21, 0.0 }
 0xbd8   : > { %1213 = vadd.xlane.f32.xlu0 %v1212_v22 }
 0xc5d   : > { %v1211_v23 = vpop.xlane.xlu1 %1210 }
 0xc5e   : > { %v1215_v25 = vmul.f32 0.03125, %v1211_v23 }
 0xc60   : > { %v1217_v26 = vsub.f32 %v1207_v2, %v1215_v25 }
 0xc61   : > { %v1214_v27 = vpop.xlane.xlu0 %1213 }
 0xc62   : > { %v1216_v29 = vmul.f32 0.03125, %v1214_v27  ;;  %v1219_v30 = vmul.f32 %v1217_v26, %v1217_v26 }
 0xc64   : > { %v1218_v11 = vsub.f32 %v1208_v21, %v1216_v29  ;;  %v1221_v31 = vsel %vm329_vm2, %v1219_v30, 0.0 }
 0xc65   : > { %1222 = vadd.xlane.f32.xlu1 %v1221_v31 }
 0xc66   : > { %v1220_v32 = vmul.f32 %v1218_v11, %v1218_v11 }
 0xc68   : > { %v1224_v53 = vsel %vm329_vm2, %v1220_v32, 0.0 }
 0xc69   : > { %1225 = vadd.xlane.f32.xlu0 %v1224_v53 }
 0xcee   : > { %v1223_v34 = vpop.xlane.xlu1 %1222 }
 0xcef   : > { %v1227_v35 = vmul.f32 0.03125, %v1223_v34 }
 0xcf1   : > { %v1229_v33 = vadd.f32 1e-12, %v1227_v35 }
 0xcf2   : > { %v1226_v37 = vpop.xlane.xlu0 %1225 }
 0xcf3   : > { %1788 = vrsqrt.f32 %v1229_v33  ;;  %v1228_v49 = vmul.f32 0.03125, %v1226_v37 }
 0xcf5   : > { %v1230_v40 = vadd.f32 1e-12, %v1228_v49 }
 0xcf7   : > { %1790 = vrsqrt.f32 %v1230_v40 }
 0xd00   : > { %v1789_v46 = vpop.eup %1788 }
 0xd01   : > { %v1233_v48 = vmul.f32 %v1789_v46, %v1217_v26 }
 0xd03   : > { %v1239_v50 = vmul.f32 %v1238_v45, %v1233_v48 }
 0xd04   : > { %v1791_v51 = vpop.eup %1790 }
 0xd05   : > { %v1245_v52 = vadd.f32 %v1244_v47, %v1239_v50  ;;  %v1234_v54 = vmul.f32 %v1791_v51, %v1218_v11 }
 0xd07   : > { %1247 = vst.msk [vmem:[#allocation2] sm:$0xff] %vm329_vm2, %v1245_v52  ;;  %v1240_v55 = vmul.f32 %v1238_v45, %v1234_v54  ;;  %1252 = sbr.rel (%p1533_p5) target bundleno = 3761 (0xeb1), region = 52 }
 0xd09   : > { %v1246_v56 = vadd.f32 %v1244_v47, %v1240_v55 }
 0xd0b   : > { %1248 = vst.msk [vmem:[#allocation2 + $0x8] sm:$0xff] %vm329_vm2, %v1246_v56 }
 0xd0c   : > { %v1792_v57 = vld [vmem:[%s2150_s3 + $0x8] sm:$0xff]   ;;  %v1253_v58 = vpack.c.bf16 %v1245_v52, %v1245_v52  ;;  %v1254_v44 = vpack.c.bf16 %v1246_v56, %v1246_v56  ;;  %v1848_v59 = vmov 0.0   ;;  %v1793_v60 = vld [vmem:[%s2150_s3] sm:$0xff]   ;;  %vm1849_vm6 = vmmov 0   ;;  %v1796_v5 = vld [vmem:[%s2150_s3 + $0x38] sm:$0xff]  }
 0xd0d   : > { %1692 = vmatprep.subr.bf16.mxu0 %v1848_v59  ;;  %1700 = vmatprep.subr.bf16.mxu1 %v1848_v59  ;;  %v1794_v63 = vld [vmem:[%s2150_s3 + $0x48] sm:$0xff]   ;;  %vm1268_vm7 = vcmask 1041409   ;;  %v1795_v1 = vld [vmem:[%s2150_s3 + $0x40] sm:$0xff]   ;;  %v1797_v6 = vld [vmem:[%s2150_s3 + $0x30] sm:$0xff]   ;;  %v1262_v12 = vrot.slane %v1900_v0, %v1004_v24  ;;  %v1328_v17 = vrot.slane %v1900_v0, 4  ;;  %v1351_v19 = vrot.slane %v1900_v0, %v1010_v28 }
 0xd0e   : > { %1693 = vmatpush3.bf16.msra.mxu0 %v1792_v57  ;;  %1696 = vmatprep.mubr.msk.bf16.mxu0 %vm1849_vm6, %v1848_v59  ;;  %v1265_v61 = vunpack.c.l.b16 %v1253_v58  ;;  %v1266_v62 = vunpack.c.l.b16 %v1254_v44  ;;  %v1798_v7 = vld [vmem:[%s2150_s3 + $0x28] sm:$0xff]   ;;  %v1799_v8 = vld [vmem:[%s2150_s3 + $0x20] sm:$0xff]   ;;  %v1800_v9 = vld [vmem:[%s2150_s3 + $0x18] sm:$0xff]  }
 0xd0f   : > { %1694 = vmatprep.subr.bf16.mxu0 %v1848_v59  ;;  %1716 = vmatprep.mubr.msk.bf16.mxu1 %vm1849_vm6, %v1848_v59  ;;  %v1801_v10 = vld [vmem:[%s2150_s3 + $0x10] sm:$0xff]  }
 0xd10   : > { %v1267_v36 = vrot.slane %v1266_v62, 7  ;;  %1701 = vmatpush3.bf16.msra.mxu1 %v1794_v63 }
 0xd11   : > { %1702 = vmatprep.subr.bf16.mxu1 %v1848_v59 }
 0xd12   : > { %1695 = vmatpush3.bf16.msra.mxu0 %v1793_v60  ;;  %v1269_v3 = vsel %vm1268_vm7, %v1267_v36, %v1265_v61 }
 0xd13   : > { %v1270_v4 = vpack.c.b16 %v1269_v3, %v1269_v3 }
 0xd14   : > { %1703 = vmatpush3.bf16.msra.mxu1 %v1795_v1 }
 0xd15   : > { %1697 = vmatmul.mubr.msk.bf16.vlgmr.msra.gmra.mxu0 %vm329_vm2, %v1270_v4  ;;  %1704 = vmatprep.subr.bf16.mxu1 %v1848_v59 }
 0xd18   : > { %1705 = vmatpush3.bf16.msra.mxu1 %v1796_v5 }
 0xd19   : > { %1706 = vmatprep.subr.bf16.mxu1 %v1848_v59 }
 0xd1c   : > { %1707 = vmatpush3.bf16.msra.mxu1 %v1797_v6 }
 0xd1d   : > { %1708 = vmatprep.subr.bf16.mxu1 %v1848_v59 }
 0xd20   : > { %1709 = vmatpush3.bf16.msra.mxu1 %v1798_v7 }
 0xd21   : > { %1710 = vmatprep.subr.bf16.mxu1 %v1848_v59 }
 0xd24   : > { %1711 = vmatpush3.bf16.msra.mxu1 %v1799_v8 }
 0xd25   : > { %1712 = vmatprep.subr.bf16.mxu1 %v1848_v59 }
 0xd28   : > { %1713 = vmatpush3.bf16.msra.mxu1 %v1800_v9 }
 0xd29   : > { %1714 = vmatprep.subr.bf16.mxu1 %v1848_v59 }
 0xd2c   : > { %1715 = vmatpush3.bf16.msra.mxu1 %v1801_v10 }
 0xdd5   : > { %v1320_v13 = vpop.f32.mrf.mxu0 }
 0xdd6   : > { %v1321_v14 = vadd.f32 %v1320_v13, %v1262_v12 }
 0xdd7   : > { %v1698_v38 = vpop.f32.mrf.mxu0 }
 0xdd8   : > { %1802 = vtanh.f32 %v1321_v14 }
 0xdd9   : > { %v1323_v15 = vpop.f32.mrf.mxu0 }
 0xddb   : > { %v1699_v16 = vpop.f32.mrf.mxu0 }
 0xde5   : > { %v1803_v2 = vpop.eup %1802 }
 0xde6   : > { %v1330_v39 = vmul.f32 %v1803_v2, %v1328_v17 }
 0xde8   : > { %v1331_v18 = vpack.c.bf16 %v1330_v39, %v1330_v39 }
 0xdea   : > { %1717 = vmatmul.mubr.bf16.vlgmr.msra.gmra.mxu1 %v1331_v18 }
 0xeaa   : > { %v1434_v20 = vpop.f32.mrf.mxu1 }
 0xeab   : > { %v1435_v21 = vadd.f32 %v1434_v20, %v1351_v19 }
 0xeac   : > { %v1718_v22 = vpop.f32.mrf.mxu1 }
 0xead   : > { %1440 = vst [vmem:[#allocation3] sm:$0x3] %v1435_v21 }
 0xeae   : > { %v1437_v24 = vpop.f32.mrf.mxu1 }
 0xeb0   : > { %v1719_v23 = vpop.f32.mrf.mxu1 }
 0xeb1 PF: > { %p1725_p6 = scmp.eq.s32.totalorder %s1892_s22, 1  ;;  %s1850_s19 = smov [#allocation3]  }
 0xeb2   : > { %s1448_s20 = sshll.u32 %s1850_s19, 4  ;;  %s1449_s20 = int_to_ptr.vmem [resolvable:$true] %s1448_s20 }
 0xeb3   : > { %s1804_s23 = scalar_lea.vmem %s1449_s20, 32  ;;  %p1811_p10 = scmp.lt.s32.totalorder %s1449_s20, %s1449_s20 }
 0xeb4   : > { %p1805_p7 = scmp.ne.s32.totalorder %s1449_s20, %s1804_s23  ;;  %p1812_p11 = scmp.lt.s32.totalorder %s1804_s23, %s1804_s23 }
 0xeb6   : > { %p1806_p8 = pnand %p1805_p7, %p1725_p6  ;;  %p1813_p12 = por %p1812_p11, %p1811_p10 }
 0xeb8   : > { %p1807_p9 = pneg %p1806_p8 }
 0xeba   : > { %p1814_p13 = pnand %p1813_p12, %p1807_p9 }
 0xebc   : > { %1817 = shalt.err (!%p1814_p13)
}
 0xebd   : > { %1722 = dma.vmem_to_hbm [thread:$0]  (%p1725_p6), %s1449_s20, 32, %s2153_s6, [#allocation4]  }
 0xebe   : > { %1833 = dma.done.wait (%p1725_p6), [#allocation4], 32  }
 0xebf   : > { %1835 = vsyncadd (%p1725_p6), [#allocation4], 4294967264 }
 0xec0 PF: > { %s17_s21 = sadd.s32 1, %s1838_s21  }
 0xec1   : > { %p14_p0 = scmp.ge.s32.totalorder %s17_s21, 4  }
 0xec3   :  { %16 = sbr.rel (!%p14_p0) target bundleno = 1 (0x1), region = 82 }
 0xec8   :  { %1461 = vsyncpa [#allocation4], 1 }
 0xec9   :  { %1463 = vsyncpa [#allocation4 + $0x1], 1 }

</bundles_post_ra>
